<compile_context>
chip_gen: v7x
topology: tpu7x:2x2x1
jax: 0.10.0
libtpu: 0.0.40
codegen_flags: <defaults>
</compile_context>

<pallas_src>
import jax
import jax.numpy as jnp
from jax.experimental import pallas as pl
from jax.experimental.pallas import tpu as pltpu

_LANES = 512           # lane-dense last dim (multiple of 128)
_MAX_TILE_ROWS = 256   # (256, 512) f32 tile = 512 KiB
_VMEM_LIMIT = 32 * 1024 * 1024


def _pad_to_tiles(x):
    """Flatten x, zero-pad, reshape to a lane+sublane dense (rows, 512) slab."""
    flat = x.reshape(-1)
    total = flat.size
    rows = -(-total // _LANES)                       # cdiv
    tile_rows = min(_MAX_TILE_ROWS, ((rows + 7) // 8) * 8)
    padded_rows = -(-rows // tile_rows) * tile_rows
    pad = padded_rows * _LANES - total
    if pad:
        flat = jnp.pad(flat, (0, pad))               # zeros: neutral for abs-max
    return flat.reshape(padded_rows, _LANES), tile_rows, total


# ----------------------------------------------------------------------------
# Kernel 1: tiled global abs-max reduction (compute_scaling_factor)
#   t_max = max(|x|) accumulated across row-tiles into a resident (1,1) output.
# ----------------------------------------------------------------------------
def _absmax_kernel(x_ref, amax_ref):
    @pl.when(pl.program_id(0) == 0)
    def _():
        amax_ref[...] = jnp.zeros_like(amax_ref)
    tile_amax = jnp.max(jnp.abs(x_ref[...].astype(jnp.float32)), keepdims=True)
    amax_ref[...] = jnp.maximum(amax_ref[...], tile_amax)


def _global_abs_max(x2d, tile_rows):
    n_tiles = x2d.shape[0] // tile_rows
    amax = pl.pallas_call(
        _absmax_kernel,
        out_shape=jax.ShapeDtypeStruct((1, 1), jnp.float32),
        grid=(n_tiles,),
        in_specs=[pl.BlockSpec((tile_rows, _LANES), lambda i: (i, 0))],
        out_specs=pl.BlockSpec((1, 1), lambda i: (0, 0)),
        compiler_params=pltpu.CompilerParams(
            dimension_semantics=("arbitrary",),      # reduction axis
            vmem_limit_bytes=_VMEM_LIMIT,
        ),
    )(x2d)
    return amax[0, 0]


# ----------------------------------------------------------------------------
# Kernel 2a: fake quantization  (quantize_tensor.forward)
#   out = clamp(round(scale * x), min_v, max_v) * (1/scale)
# Kernel 2b: integer quantization  (int_quantize_tensor.forward)
#   out = clamp(round(scale * x), min_v, max_v).astype(dtype)
# Scalars arrive via SMEM: [scale, inv_scale, min_v, max_v].
# ----------------------------------------------------------------------------
def _fake_quant_kernel(scalars_ref, x_ref, o_ref):
    s = scalars_ref[0]
    inv_s = scalars_ref[1]
    min_v = scalars_ref[2]
    max_v = scalars_ref[3]
    x = x_ref[...].astype(jnp.float32)
    q = jnp.clip(jnp.round(s * x), min_v, max_v)
    o_ref[...] = (q * inv_s).astype(o_ref.dtype)


def _int_quant_kernel(scalars_ref, x_ref, o_ref):
    s = scalars_ref[0]
    min_v = scalars_ref[2]
    max_v = scalars_ref[3]
    x = x_ref[...].astype(jnp.float32)
    q = jnp.clip(jnp.round(s * x), min_v, max_v)
    o_ref[...] = q.astype(o_ref.dtype)


def _run_quant_kernel(kernel_fn, x2d, tile_rows, scalars, out_dtype):
    n_tiles = x2d.shape[0] // tile_rows
    return pl.pallas_call(
        kernel_fn,
        out_shape=jax.ShapeDtypeStruct(x2d.shape, out_dtype),
        grid=(n_tiles,),
        in_specs=[
            pl.BlockSpec(memory_space=pltpu.MemorySpace.SMEM),    # scalars
            pl.BlockSpec((tile_rows, _LANES), lambda i: (i, 0)),  # x tile
        ],
        out_specs=pl.BlockSpec((tile_rows, _LANES), lambda i: (i, 0)),
        compiler_params=pltpu.CompilerParams(
            dimension_semantics=("parallel",),       # megacore on v7x
            vmem_limit_bytes=_VMEM_LIMIT,
        ),
    )(scalars, x2d)


# ----------------------------------------------------------------------------
# param_quantizer forward
# ----------------------------------------------------------------------------
def param_quantizer_forward(x, min_val, max_val, fake_quant=True,
                            dtype=jnp.int32):
    """Mirrors param_quantizer.forward: returns (output, scaling_factor)."""
    orig_shape = x.shape
    x2d, tile_rows, total = _pad_to_tiles(x)

    # compute_scaling_factor: t_max = max(|x|); 0 -> 1; scale = max_val / t_max
    t_max = _global_abs_max(x2d, tile_rows)
    t_max = jnp.where(t_max == 0.0, jnp.float32(1.0), t_max)
    scaling_factor = jnp.float32(max_val) / t_max
    inv_scaling = jnp.float32(1.0) / scaling_factor

    scalars = jnp.stack([
        scaling_factor,
        inv_scaling,
        jnp.float32(min_val),
        jnp.float32(max_val),
    ]).astype(jnp.float32)

    if fake_quant:
        out2d = _run_quant_kernel(_fake_quant_kernel, x2d, tile_rows,
                                  scalars, x.dtype)
    else:
        out2d = _run_quant_kernel(_int_quant_kernel, x2d, tile_rows,
                                  scalars, dtype)

    out = out2d.reshape(-1)[:total].reshape(orig_shape)
    return out, scaling_factor


# Pure-JAX reference for correctness checking.
def _ref_forward(x, min_val, max_val, fake_quant=True, dtype=jnp.int32):
    xf = x.astype(jnp.float32)
    t_max = jnp.maximum(jnp.abs(jnp.min(xf)), jnp.abs(jnp.max(xf)))
    t_max = jnp.where(t_max == 0.0, 1.0, t_max)
    scale = jnp.float32(max_val) / t_max
    q = jnp.clip(jnp.round(scale * xf), min_val, max_val)
    if fake_quant:
        return q / scale, scale
    return q.astype(dtype), scale


if __name__ == "__main__":
    key = jax.random.PRNGKey(0)
    # Small NCHW-ish tensor of parameters to quantize.
    x = jax.random.normal(key, (2, 4, 16, 16), dtype=jnp.float32) * 3.0

    min_val, max_val = -128.0, 127.0  # int8-style range

    # fake quantization path (default)
    out_fake, scale_fake = param_quantizer_forward(
        x, min_val, max_val, fake_quant=True)
    jax.block_until_ready(out_fake)

    # integer quantization path
    out_int, scale_int = param_quantizer_forward(
        x, min_val, max_val, fake_quant=False, dtype=jnp.int32)
    jax.block_until_ready(out_int)

    # Verify against the pure-JAX reference.
    ref_fake, ref_scale = _ref_forward(x, min_val, max_val, fake_quant=True)
    ref_int, _ = _ref_forward(x, min_val, max_val, fake_quant=False)

    assert jnp.allclose(scale_fake, ref_scale, rtol=1e-6), "scale mismatch"
    # Kernel multiplies by a precomputed reciprocal (vs. reference divide),
    # so allow ~1 ulp of slack.
    assert jnp.allclose(out_fake, ref_fake, rtol=1e-5, atol=1e-5), \
        "fake-quant output mismatch"
    assert jnp.array_equal(out_int, ref_int), "int-quant output mismatch"
    assert out_fake.shape == x.shape and out_int.dtype == jnp.int32

    print("KERNEL_OK")
</pallas_src>

<mosaic_0001>
module attributes {stable_mosaic.version = 11 : i64} {
  func.func @_absmax_kernel(%arg0: i32, %arg1: memref<8x512xf32, #tpu.memory_space<vmem>>, %arg2: memref<1x1xf32, #tpu.memory_space<vmem>>) attributes {dimension_semantics = [#tpu.dimension_semantics<arbitrary>], iteration_bounds = array<i64: 1>, scalar_prefetch = 0 : i64, scratch_operands = 0 : i64, tpu.core_type = #tpu.core_type<tc>, window_params = [{transform_indices = @transform_0, window_bounds = array<i64: 8, 512>}, {pipeline_mode = #tpu.pipeline_mode<synchronous>, transform_indices = @transform_1, window_bounds = array<i64: 1, 1>}]} {
    %c0_i32 = arith.constant 0 : i32
    %0 = arith.cmpi eq, %arg0, %c0_i32 : i32
    %1 = arith.extui %0 : i1 to i32
    %c0_i32_0 = arith.constant 0 : i32
    %2 = arith.cmpi ne, %1, %c0_i32_0 : i32
    scf.if %2 {
      %cst_6 = arith.constant 0.000000e+00 : f32
      %13 = vector.broadcast %cst_6 : f32 to vector<1x1xf32>
      %c0_7 = arith.constant 0 : index
      %c0_8 = arith.constant 0 : index
      %14 = vector.load %arg2[%c0_7, %c0_8] : memref<1x1xf32, #tpu.memory_space<vmem>>, vector<1x1xf32>
      tpu.vector_store %arg2[%c0_7, %c0_8], %13 {strides = array<i32>} : memref<1x1xf32, #tpu.memory_space<vmem>>, vector<1x1xf32>,
    } else {
    }
    %c0 = arith.constant 0 : index
    %c0_1 = arith.constant 0 : index
    %3 = vector.load %arg1[%c0, %c0_1] : memref<8x512xf32, #tpu.memory_space<vmem>>, vector<8x512xf32>
    %4 = math.absf %3 : vector<8x512xf32>
    %5 = vector.shape_cast %4 : vector<8x512xf32> to vector<1x8x512xf32>
    %cst = arith.constant dense<0xFF800000> : vector<1xf32>
    %6 = vector.multi_reduction <maximumf>, %5, %cst [1, 2] : vector<1x8x512xf32> to vector<1xf32>
    %7 = vector.shape_cast %6 : vector<1xf32> to vector<1x1x1xf32>
    %8 = vector.extract %7[0, 0, 0] : f32 from vector<1x1x1xf32>
    %9 = vector.broadcast %8 : f32 to vector<1x1xf32>
    %c0_2 = arith.constant 0 : index
    %c0_3 = arith.constant 0 : index
    %10 = vector.load %arg2[%c0_2, %c0_3] : memref<1x1xf32, #tpu.memory_space<vmem>>, vector<1x1xf32>
    %11 = arith.maximumf %10, %9 : vector<1x1xf32>
    %c0_4 = arith.constant 0 : index
    %c0_5 = arith.constant 0 : index
    %12 = vector.load %arg2[%c0_4, %c0_5] : memref<1x1xf32, #tpu.memory_space<vmem>>, vector<1x1xf32>
    tpu.vector_store %arg2[%c0_4, %c0_5], %11 {strides = array<i32>} : memref<1x1xf32, #tpu.memory_space<vmem>>, vector<1x1xf32>,
    return
  }
  func.func @transform_0(%arg0: i32) -> (i32, i32) {
    %c0_i32 = arith.constant 0 : i32
    %c0_i32_0 = arith.constant 0 : i32
    return %arg0, %c0_i32 : i32, i32
  }
  func.func @transform_1(%arg0: i32) -> (i32, i32) {
    %c0_i32 = arith.constant 0 : i32
    %c0_i32_0 = arith.constant 0 : i32
    %c0_i32_1 = arith.constant 0 : i32
    return %c0_i32, %c0_i32_0 : i32, i32
  }
}

</mosaic_0001>

<bundles_post_ra>
// kernel: tpu_custom_call.1
= control target key start
LH: loop header
LB: loop body
LE: loop exit
PB: predicated region body
PF: predicated region fallthrough
CT: control target
= control target key end

     0   :  { %6 = vsyncpa [#allocation3], 0  ;;  %s162_s0 = inlined_call_operand.hbm [shape: f32[8,512], index: 0, kind: input, shape index: {}]   ;;  %s163_s1 = inlined_call_operand.hbm [shape: f32[1,1], index: 1, kind: output, shape index: {}]  }
   0x1   :  { %7 = vsyncpa [#allocation4], 0  ;;  %s123_s6 = smov [#allocation2]   ;;  %s72_s10 = scalar_lea.hbm %s162_s0, 512 }
   0x2   :  { %s14_s7 = sshll.u32 %s123_s6, 4  ;;  %p73_p0 = scmp.ne.s32.totalorder %s162_s0, %s72_s10  ;;  %s15_s7 = int_to_ptr.vmem [resolvable:$true] %s14_s7 }
   0x3   :  { %p76_p1 = scmp.lt.u32.totalorder %s72_s10, %s162_s0 }
   0x5   :  { %p78_p2 = pnand %p76_p1, %p73_p0 }
   0x7   :  { %81 = shalt.err (!%p78_p2)
}
   0x8   :  { %s82_s15 = scalar_lea.vmem %s15_s7, 512  ;;  %p87_p4 = scmp.lt.s32.totalorder %s15_s7, %s15_s7 }
   0x9   :  { %p83_p3 = scmp.ne.s32.totalorder %s15_s7, %s82_s15  ;;  %p88_p5 = scmp.lt.s32.totalorder %s82_s15, %s82_s15 }
   0xb   :  { %p89_p6 = por %p88_p5, %p87_p4 }
   0xd   :  { %p90_p7 = pnand %p89_p6, %p83_p3 }
   0xf   :  { %93 = shalt.err (!%p90_p7)
}
  0x10   :  { %17 = dma.hbm_to_vmem [thread:$0]  %s162_s0, 512, %s15_s7, [#allocation3]  }
  0x11   :  { %116 = dma.done.wait [#allocation3], 512  }
  0x12   :  { %117 = vsyncadd [#allocation3], 4294966784  ;;  %vm25_vm0 = vcmask 0   ;;  %v124_v0 = vmov 0.0   ;;  %v27_v1 = vld [vmem:[#allocation2] sm:$0xff]  ;;  %v28_v2 = vld [vmem:[#allocation2 + $0x8] sm:$0xff] }
  0x13   :  { %26 = vst.msk [vmem:[#allocation5] sm:$0x1] %vm25_vm0, %v124_v0  ;;  %v29_v3 = vld [vmem:[#allocation2 + $0x10] sm:$0xff]  ;;  %v30_v4 = vld [vmem:[#allocation2 + $0x18] sm:$0xff]  ;;  %120 = vmaxabs.init.f32.vacc0 %v27_v1, %v28_v2  ;;  %s125_s0 = smov [#allocation5]  }
  0x14   :  { %s58_s18 = sshll.u32 %s125_s0, 4  ;;  %s59_s18 = int_to_ptr.vmem [resolvable:$true] %s58_s18 }
  0x15   :  { %121 = vmaxabs.f32.vacc0 %v29_v3, %v30_v4  ;;  %s94_s20 = scalar_lea.vmem %s59_s18, 16  ;;  %s98_s21 = scalar_lea.vmem %s59_s18, 32 }
  0x16   :  { %p95_p8 = scmp.ne.s32.totalorder %s59_s18, %s94_s20  ;;  %p99_p9 = scmp.lt.s32.totalorder %s59_s18, %s59_s18 }
  0x17   :  { %v122_v5 = vmovacc.low.even.vacc0  ;;  %p100_p10 = scmp.lt.s32.totalorder %s98_s21, %s94_s20 }
  0x19   :  { %38 = vmax.xlane.f32.xlu0 %v122_v5  ;;  %p101_p11 = por %p100_p10, %p99_p9 }
  0x1a   :  { %v48_v13 = vld [vmem:[#allocation5] sm:$0x1] }
  0x1b   :  { %p102_p12 = pnand %p101_p11, %p95_p8 }
  0xa6   :  { %v39_v6 = vpop.xlane.xlu0 %38 }
  0xa7   :  { %v40_v7 = vrot.slane %v39_v6, 4 }
  0xa9   :  { %v41_v8 = vmax.f32 %v39_v6, %v40_v7 }
  0xab   :  { %v42_v9 = vrot.slane %v41_v8, 2 }
  0xad   :  { %v43_v10 = vmax.f32 %v41_v8, %v42_v9 }
  0xaf   :  { %v44_v11 = vrot.slane %v43_v10, 1 }
  0xb1   :  { %v45_v12 = vmax.f32 %v43_v10, %v44_v11 }
  0xb3   :  { %67 = vpush %v45_v12 }
  0xe4   :  { %s68_s19 = spop %67 }
  0xe5   :  { %v47_v14 = vstv %s68_s19 }
  0xe6   :  { %v49_v15 = vmax.f32 %v48_v13, %v47_v14 }
  0xe8   :  { %51 = vst.msk [vmem:[#allocation5] sm:$0x1] %vm25_vm0, %v49_v15 }
  0xe9   :  { %105 = shalt.err (!%p102_p12)
}
  0xea   :  { %s106_s24 = scalar_lea.hbm %s163_s1, 16 }
  0xeb   :  { %p107_p13 = scmp.ne.s32.totalorder %s163_s1, %s106_s24  ;;  %p110_p0 = scmp.lt.u32.totalorder %s106_s24, %s163_s1 }
  0xed   :  { %p112_p1 = pnand %p110_p0, %p107_p13 }
  0xef   :  { %115 = shalt.err (!%p112_p1)
}
  0xf0   :  { %61 = dma.vmem_to_hbm [thread:$0]  %s59_s18, 16, %s163_s1, [#allocation4]  }
  0xf1   :  { %118 = dma.done.wait [#allocation4], 16  }
  0xf2   :  { %119 = vsyncadd [#allocation4], 4294967280 }
  0xf3   :  { %65 = vsyncpa [#allocation3], 1 }
  0xf4   :  { %66 = vsyncpa [#allocation4], 1 }

</bundles_post_ra>
